<compile_context>
chip_gen: v7x
topology: tpu7x:2x2x1
jax: 0.10.0
libtpu: 0.0.40
codegen_flags: <defaults>
</compile_context>

<pallas_src>
import functools

import jax
import jax.numpy as jnp
from jax.experimental import pallas as pl
from jax.experimental.pallas import tpu as pltpu


# ---------------------------------------------------------------------------
# Pallas kernel: the whole forward pass for one batch tile.
# ---------------------------------------------------------------------------
def _osc_att_kernel(x_ref,
                    wcat_ref, bcat_ref,      # fused [lin1 | att1] (FC, LeakyReLU)
                    wa2_ref, ba2_ref,        # att2 with gather folded in (Tanh)
                    w2_ref, b2_ref,          # lin2 (GroupFC block-diag, LeakyReLU)
                    w3_ref, b3_ref,          # lin3 (GroupFC block-diag, Identity)
                    o_ref,
                    *, h_pad):
    leaky = lambda v: jnp.where(v > 0, v, 0.01 * v)   # nn.LeakyReLU default slope
    cdt = wcat_ref.dtype                              # matmul compute dtype (bf16)

    # x arrives as f32; cast to bf16 in-kernel (VPU slack -> free).
    x = x_ref[...].astype(cdt)

    # [lin1 | att1](x): one fused MXU pass; the split lands on 128-lane
    # boundaries thanks to the padded weight layout.
    hcat = leaky(jnp.dot(x, wcat_ref[...], preferred_element_type=jnp.float32)
                 + bcat_ref[...])
    h1 = hcat[:, :h_pad]        # lin1 activations (pad lanes are exactly 0)
    a1 = hcat[:, h_pad:]        # att1 activations (pad lanes are exactly 0)

    # att = gather(att2(att1(x))): the per-group oscillator gather is baked
    # into wa2_rep's replicated column blocks, so no in-kernel concat.
    att = jnp.tanh(jnp.dot(a1.astype(cdt), wa2_ref[...],
                           preferred_element_type=jnp.float32)
                   + ba2_ref[...])

    # lin3(lin2(att * lin1(x)))
    h2 = leaky(jnp.dot((att * h1).astype(cdt), w2_ref[...],
                       preferred_element_type=jnp.float32)
               + b2_ref[...])
    out = jnp.dot(h2.astype(cdt), w3_ref[...],
                  preferred_element_type=jnp.float32) + b3_ref[...]

    # Narrow (out_dim-wide) store: masked vst, but ~10x less HBM writeback
    # than a 128-lane pad and the DMA fully hides it (kernel is mem-bound).
    o_ref[...] = out.astype(o_ref.dtype)


# ---------------------------------------------------------------------------
# Wrapper: builds BlockSpecs / grid and calls pallas_call.
# ---------------------------------------------------------------------------
def oscillator_attention_forward(x, params, meta, *, batch_tile=None):
    B, D_in = x.shape
    (wcat, bcat, wa2, ba2, w2, b2, w3, b3) = params
    out_dim = w3.shape[1]

    # Large batch tiles approach the HBM roofline; always keep >= 2 grid
    # steps so the BlockSpec pipeline overlaps x/out DMA with compute and
    # v7x's two TensorCores both get work on the "parallel" axis.
    if batch_tile is None:
        tb = min(512, B)
        if B > 8 and pl.cdiv(B, tb) < 2:
            # Halve the tile (rounded up to a multiple of 8 for sublane
            # alignment) so the grid has at least 2 steps.
            tb = max(8, (((B + 1) // 2 + 7) // 8) * 8)
    else:
        tb = batch_tile
    grid = (pl.cdiv(B, tb),)

    batch_map = lambda i: (i, 0)
    bcast_map = lambda i: (0, 0)
    full = lambda a: pl.BlockSpec(a.shape, bcast_map)

    kernel = functools.partial(_osc_att_kernel, h_pad=meta["h_pad"])

    out = pl.pallas_call(
        kernel,
        out_shape=jax.ShapeDtypeStruct((B, out_dim), jnp.float32),
        grid_spec=pltpu.PrefetchScalarGridSpec(
            num_scalar_prefetch=0,
            grid=grid,
            in_specs=[
                pl.BlockSpec((tb, D_in), batch_map),   # x tile (f32, cast in-kernel)
                full(wcat), full(bcat),
                full(wa2), full(ba2),
                full(w2), full(b2),
                full(w3), full(b3),
            ],
            out_specs=pl.BlockSpec((tb, out_dim), batch_map),
        ),
        compiler_params=pltpu.CompilerParams(
            dimension_semantics=("parallel",),
            vmem_limit_bytes=32 * 1024 * 1024),
    )(x, wcat, bcat, wa2, ba2, w2, b2, w3, b3)

    return out.astype(x.dtype)


# ---------------------------------------------------------------------------
# Deterministic parameter construction (synthetic init, no checkpoint).
# Returns (fused/padded kernel params, original-structure reference params,
# meta).
# ---------------------------------------------------------------------------
def make_params(key, *, named_division, oscillators, input_dim,
                hidden_dim_per_group, weight_dtype=jnp.bfloat16):
    division = list(named_division.values())
    G = len(division)
    Hg = hidden_dim_per_group
    H_total = G * Hg
    out_dim = sum(division)
    n_osc = len(oscillators)
    A_total = n_osc * Hg
    pad128 = lambda n: ((n + 127) // 128) * 128
    H_pad = pad128(H_total)          # lin1 / lin2 width, lane-aligned
    A_pad = pad128(A_total)          # att1 width, lane-aligned

    osc_group = [0] * G
    for osc_id, param_ids in enumerate(oscillators):
        for pid in param_ids:
            osc_group[pid] = osc_id

    keys = jax.random.split(key, 10)
    init = lambda k, shape, fan_in: (jax.random.normal(k, shape, jnp.float32)
                                     * (1.0 / jnp.sqrt(fan_in)))

    # ---- original-structure weights (used by the reference) ----------------
    w1 = init(keys[0], (input_dim, H_total), input_dim)      # lin1
    b1 = init(keys[1], (1, H_total), input_dim)
    wa1 = init(keys[2], (input_dim, A_total), input_dim)      # att1
    ba1 = init(keys[3], (1, A_total), input_dim)

    blocks_a2 = init(keys[4], (n_osc, Hg, Hg), Hg)            # att2 blocks
    ba2 = init(keys[5], (1, A_total), Hg)

    blocks_2 = init(keys[6], (G, Hg, Hg), Hg)                 # lin2 blocks
    b2 = init(keys[7], (1, H_total), Hg)

    k3 = jax.random.split(keys[8], G)
    blocks_3 = [init(k3[g], (Hg, division[g]), Hg) for g in range(G)]
    b3 = init(keys[9], (1, out_dim), Hg)

    wa2_bd = jnp.zeros((A_total, A_total), jnp.float32)
    for o in range(n_osc):
        wa2_bd = wa2_bd.at[o * Hg:(o + 1) * Hg, o * Hg:(o + 1) * Hg].set(blocks_a2[o])
    w2_bd = jnp.zeros((H_total, H_total), jnp.float32)
    for g in range(G):
        w2_bd = w2_bd.at[g * Hg:(g + 1) * Hg, g * Hg:(g + 1) * Hg].set(blocks_2[g])
    w3_bd = jnp.zeros((H_total, out_dim), jnp.float32)
    off = 0
    for g, d in enumerate(division):
        w3_bd = w3_bd.at[g * Hg:(g + 1) * Hg, off:off + d].set(blocks_3[g])
        off += d

    ref_params = dict(w1=w1, b1=b1, wa1=wa1, ba1=ba1, wa2=wa2_bd, ba2=ba2,
                      w2=w2_bd, b2=b2, w3=w3_bd, b3=b3)

    # ---- fused / padded kernel weights --------------------------------------
    # [lin1 | att1] fused along the output axis; each part zero-padded to a
    # 128-lane boundary (zero pad bias -> LeakyReLU(0)=0 keeps math exact).
    wcat = jnp.zeros((input_dim, H_pad + A_pad), jnp.float32)
    bcat = jnp.zeros((1, H_pad + A_pad), jnp.float32)
    wcat = wcat.at[:, :H_total].set(w1)
    bcat = bcat.at[:, :H_total].set(b1)
    wcat = wcat.at[:, H_pad:H_pad + A_total].set(wa1)
    bcat = bcat.at[:, H_pad:H_pad + A_total].set(ba1)

    # att2 with the oscillator gather folded in: column block g carries the
    # att2 block (and bias) of oscillator osc_group[g], so the matmul output
    # is already in group order.  Pad rows/cols stay zero.
    wa2_rep = jnp.zeros((A_pad, H_pad), jnp.float32)
    ba2_rep = jnp.zeros((1, H_pad), jnp.float32)
    for g in range(G):
        o = osc_group[g]
        wa2_rep = wa2_rep.at[o * Hg:(o + 1) * Hg, g * Hg:(g + 1) * Hg].set(blocks_a2[o])
        ba2_rep = ba2_rep.at[:, g * Hg:(g + 1) * Hg].set(ba2[:, o * Hg:(o + 1) * Hg])

    # lin2: block-diagonal, zero-padded to H_pad (pad rows/cols/bias zero).
    w2p = jnp.zeros((H_pad, H_pad), jnp.float32)
    b2p = jnp.zeros((1, H_pad), jnp.float32)
    w2p = w2p.at[:H_total, :H_total].set(w2_bd)
    b2p = b2p.at[:, :H_total].set(b2)

    # lin3: rectangular block-diagonal, rows padded to H_pad, columns kept at
    # the true out_dim (narrow output store, no 128-lane writeback pad).
    w3p = jnp.zeros((H_pad, out_dim), jnp.float32)
    w3p = w3p.at[:H_total, :].set(w3_bd)
    b3p = b3

    wd = weight_dtype
    params = (wcat.astype(wd), bcat,
              wa2_rep.astype(wd), ba2_rep,
              w2p.astype(wd), b2p,
              w3p.astype(wd), b3p)
    meta = dict(osc_group=tuple(osc_group), hg=Hg, h_total=H_total,
                h_pad=H_pad, a_pad=A_pad, out_dim=out_dim, n_osc=n_osc)
    return params, ref_params, meta


# ---------------------------------------------------------------------------
# Pure-JAX reference mirroring the original PyTorch forward structure
# (separate lin1/att1, block-diag att2 + oscillator gather, block-diag
# lin2/lin3), with the same bf16 matmul operands / f32 accumulation as the
# kernel.  Validates both the weight fusion/padding and the kernel itself.
# NOTE: bf16-vs-true-f32-PyTorch rounding error is not measured here.
# ---------------------------------------------------------------------------
def reference_forward(x, ref_params, meta, compute_dtype=jnp.bfloat16):
    p = ref_params
    hg, osc_group = meta["hg"], meta["osc_group"]
    leaky = lambda v: jnp.where(v > 0, v, 0.01 * v)
    dot = lambda a, w: jnp.dot(a.astype(compute_dtype), w.astype(compute_dtype),
                               preferred_element_type=jnp.float32)

    h1 = leaky(dot(x, p["w1"]) + p["b1"])                       # lin1
    a1 = leaky(dot(x, p["wa1"]) + p["ba1"])                     # att1
    oscatt = jnp.tanh(dot(a1, p["wa2"]) + p["ba2"])             # att2
    att = jnp.concatenate([oscatt[:, o * hg:(o + 1) * hg] for o in osc_group],
                          axis=-1)                               # gather
    h2 = leaky(dot(att * h1, p["w2"]) + p["b2"])                # lin2
    return dot(h2, p["w3"]) + p["b3"]                           # lin3


if __name__ == "__main__":
    # Small synthetic configuration consistent with the module's __init__.
    named_division = {"pitch": 3, "gain": 5, "timbre": 4}   # division = [3, 5, 4]
    oscillators = [[0, 2], [1]]                              # 2 oscillators
    input_dim = 64
    hidden_dim_per_group = 32
    B = 256                                                  # 2 x 128-row tiles

    key = jax.random.PRNGKey(0)
    kx, kp = jax.random.split(key)
    x = jax.random.normal(kx, (B, input_dim), jnp.float32)

    params, ref_params, meta = make_params(
        kp,
        named_division=named_division,
        oscillators=oscillators,
        input_dim=input_dim,
        hidden_dim_per_group=hidden_dim_per_group)

    out = oscillator_attention_forward(x, params, meta)
    out = jax.block_until_ready(out)

    ref = reference_forward(x, ref_params, meta)
    assert out.shape == (B, meta["out_dim"])
    assert jnp.allclose(out, ref, atol=2e-3, rtol=2e-3), "kernel mismatch vs reference"

    print("KERNEL_OK")
</pallas_src>

<mosaic_0001>
module attributes {stable_mosaic.version = 11 : i64} {
  func.func @_osc_att_kernel(%arg0: i32, %arg1: memref<128x64xf32, #tpu.memory_space<vmem>>, %arg2: memref<64x256xbf16, #tpu.memory_space<vmem>>, %arg3: memref<1x256xf32, #tpu.memory_space<vmem>>, %arg4: memref<128x128xbf16, #tpu.memory_space<vmem>>, %arg5: memref<1x128xf32, #tpu.memory_space<vmem>>, %arg6: memref<128x128xbf16, #tpu.memory_space<vmem>>, %arg7: memref<1x128xf32, #tpu.memory_space<vmem>>, %arg8: memref<128x12xbf16, #tpu.memory_space<vmem>>, %arg9: memref<1x12xf32, #tpu.memory_space<vmem>>, %arg10: memref<128x12xf32, #tpu.memory_space<vmem>>) attributes {dimension_semantics = [#tpu.dimension_semantics<parallel>], iteration_bounds = array<i64: 2>, scalar_prefetch = 0 : i64, scratch_operands = 0 : i64, tpu.core_type = #tpu.core_type<tc>, window_params = [{transform_indices = @transform_0, window_bounds = array<i64: 128, 64>}, {pipeline_mode = #tpu.pipeline_mode<synchronous>, transform_indices = @transform_1, window_bounds = array<i64: 64, 256>}, {pipeline_mode = #tpu.pipeline_mode<synchronous>, transform_indices = @transform_2, window_bounds = array<i64: 1, 256>}, {pipeline_mode = #tpu.pipeline_mode<synchronous>, transform_indices = @transform_3, window_bounds = array<i64: 128, 128>}, {pipeline_mode = #tpu.pipeline_mode<synchronous>, transform_indices = @transform_4, window_bounds = array<i64: 1, 128>}, {pipeline_mode = #tpu.pipeline_mode<synchronous>, transform_indices = @transform_5, window_bounds = array<i64: 128, 128>}, {pipeline_mode = #tpu.pipeline_mode<synchronous>, transform_indices = @transform_6, window_bounds = array<i64: 1, 128>}, {pipeline_mode = #tpu.pipeline_mode<synchronous>, transform_indices = @transform_7, window_bounds = array<i64: 128, 12>}, {pipeline_mode = #tpu.pipeline_mode<synchronous>, transform_indices = @transform_8, window_bounds = array<i64: 1, 12>}, {transform_indices = @transform_9, window_bounds = array<i64: 128, 12>}]} {
    %c0 = arith.constant 0 : index
    %c0_0 = arith.constant 0 : index
    %0 = vector.load %arg1[%c0, %c0_0] : memref<128x64xf32, #tpu.memory_space<vmem>>, vector<128x64xf32>
    %1 = arith.truncf %0 : vector<128x64xf32> to vector<128x64xbf16>
    %c0_1 = arith.constant 0 : index
    %c0_2 = arith.constant 0 : index
    %2 = vector.load %arg2[%c0_1, %c0_2] : memref<64x256xbf16, #tpu.memory_space<vmem>>, vector<64x256xbf16>
    %cst = arith.constant dense<0.000000e+00> : vector<128x256xf32>
    %3 = tpu.matmul %1, %2, %cst {dimension_numbers = #tpu.dot_dimension_numbers<[1], [0], [0], [1], [0, 0, 1, 1], [], []>} : vector<128x64xbf16>, vector<64x256xbf16>, vector<128x256xf32> -> vector<128x256xf32>
    %c0_3 = arith.constant 0 : index
    %c0_4 = arith.constant 0 : index
    %4 = vector.load %arg3[%c0_3, %c0_4] : memref<1x256xf32, #tpu.memory_space<vmem>>, vector<1x256xf32>
    %5 = vector.broadcast %4 : vector<1x256xf32> to vector<128x256xf32>
    %6 = arith.addf %3, %5 : vector<128x256xf32>
    %cst_5 = arith.constant 0.000000e+00 : f32
    %7 = vector.broadcast %cst_5 : f32 to vector<128x256xf32>
    %8 = arith.cmpf ogt, %6, %7 : vector<128x256xf32>
    %cst_6 = arith.constant 0.00999999977 : f32
    %9 = vector.broadcast %cst_6 : f32 to vector<128x256xf32>
    %10 = arith.mulf %9, %6 : vector<128x256xf32>
    %11 = arith.select %8, %6, %10 : vector<128x256xi1>, vector<128x256xf32>
    %12 = vector.extract_strided_slice %11 {offsets = [0, 0], sizes = [128, 128], strides = [1, 1]} : vector<128x256xf32> to vector<128x128xf32>
    %13 = vector.extract_strided_slice %11 {offsets = [0, 128], sizes = [128, 128], strides = [1, 1]} : vector<128x256xf32> to vector<128x128xf32>
    %14 = arith.truncf %13 : vector<128x128xf32> to vector<128x128xbf16>
    %c0_7 = arith.constant 0 : index
    %c0_8 = arith.constant 0 : index
    %15 = vector.load %arg4[%c0_7, %c0_8] : memref<128x128xbf16, #tpu.memory_space<vmem>>, vector<128x128xbf16>
    %cst_9 = arith.constant dense<0.000000e+00> : vector<128x128xf32>
    %16 = tpu.matmul %14, %15, %cst_9 {dimension_numbers = #tpu.dot_dimension_numbers<[1], [0], [0], [1], [0, 0, 1, 1], [], []>} : vector<128x128xbf16>, vector<128x128xbf16>, vector<128x128xf32> -> vector<128x128xf32>
    %c0_10 = arith.constant 0 : index
    %c0_11 = arith.constant 0 : index
    %17 = vector.load %arg5[%c0_10, %c0_11] : memref<1x128xf32, #tpu.memory_space<vmem>>, vector<1x128xf32>
    %18 = vector.broadcast %17 : vector<1x128xf32> to vector<128x128xf32>
    %19 = arith.addf %16, %18 : vector<128x128xf32>
    %20 = math.tanh %19 : vector<128x128xf32>
    %21 = arith.mulf %20, %12 : vector<128x128xf32>
    %22 = arith.truncf %21 : vector<128x128xf32> to vector<128x128xbf16>
    %c0_12 = arith.constant 0 : index
    %c0_13 = arith.constant 0 : index
    %23 = vector.load %arg6[%c0_12, %c0_13] : memref<128x128xbf16, #tpu.memory_space<vmem>>, vector<128x128xbf16>
    %cst_14 = arith.constant dense<0.000000e+00> : vector<128x128xf32>
    %24 = tpu.matmul %22, %23, %cst_14 {dimension_numbers = #tpu.dot_dimension_numbers<[1], [0], [0], [1], [0, 0, 1, 1], [], []>} : vector<128x128xbf16>, vector<128x128xbf16>, vector<128x128xf32> -> vector<128x128xf32>
    %c0_15 = arith.constant 0 : index
    %c0_16 = arith.constant 0 : index
    %25 = vector.load %arg7[%c0_15, %c0_16] : memref<1x128xf32, #tpu.memory_space<vmem>>, vector<1x128xf32>
    %26 = vector.broadcast %25 : vector<1x128xf32> to vector<128x128xf32>
    %27 = arith.addf %24, %26 : vector<128x128xf32>
    %cst_17 = arith.constant 0.000000e+00 : f32
    %28 = vector.broadcast %cst_17 : f32 to vector<128x128xf32>
    %29 = arith.cmpf ogt, %27, %28 : vector<128x128xf32>
    %cst_18 = arith.constant 0.00999999977 : f32
    %30 = vector.broadcast %cst_18 : f32 to vector<128x128xf32>
    %31 = arith.mulf %30, %27 : vector<128x128xf32>
    %32 = arith.select %29, %27, %31 : vector<128x128xi1>, vector<128x128xf32>
    %33 = arith.truncf %32 : vector<128x128xf32> to vector<128x128xbf16>
    %c0_19 = arith.constant 0 : index
    %c0_20 = arith.constant 0 : index
    %34 = vector.load %arg8[%c0_19, %c0_20] : memref<128x12xbf16, #tpu.memory_space<vmem>>, vector<128x12xbf16>
    %cst_21 = arith.constant dense<0.000000e+00> : vector<128x12xf32>
    %35 = tpu.matmul %33, %34, %cst_21 {dimension_numbers = #tpu.dot_dimension_numbers<[1], [0], [0], [1], [0, 0, 1, 1], [], []>} : vector<128x128xbf16>, vector<128x12xbf16>, vector<128x12xf32> -> vector<128x12xf32>
    %c0_22 = arith.constant 0 : index
    %c0_23 = arith.constant 0 : index
    %36 = vector.load %arg9[%c0_22, %c0_23] : memref<1x12xf32, #tpu.memory_space<vmem>>, vector<1x12xf32>
    %37 = vector.broadcast %36 : vector<1x12xf32> to vector<128x12xf32>
    %38 = arith.addf %35, %37 : vector<128x12xf32>
    %c0_24 = arith.constant 0 : index
    %c0_25 = arith.constant 0 : index
    %39 = vector.load %arg10[%c0_24, %c0_25] : memref<128x12xf32, #tpu.memory_space<vmem>>, vector<128x12xf32>
    tpu.vector_store %arg10[%c0_24, %c0_25], %38 {strides = array<i32>} : memref<128x12xf32, #tpu.memory_space<vmem>>, vector<128x12xf32>,
    return
  }
  func.func @transform_0(%arg0: i32) -> (i32, i32) {
    %c0_i32 = arith.constant 0 : i32
    %c0_i32_0 = arith.constant 0 : i32
    return %arg0, %c0_i32 : i32, i32
  }
  func.func @transform_1(%arg0: i32) -> (i32, i32) {
    %c0_i32 = arith.constant 0 : i32
    %c0_i32_0 = arith.constant 0 : i32
    %c0_i32_1 = arith.constant 0 : i32
    return %c0_i32, %c0_i32_0 : i32, i32
  }
  func.func @transform_2(%arg0: i32) -> (i32, i32) {
    %c0_i32 = arith.constant 0 : i32
    %c0_i32_0 = arith.constant 0 : i32
    %c0_i32_1 = arith.constant 0 : i32
    return %c0_i32, %c0_i32_0 : i32, i32
  }
  func.func @transform_3(%arg0: i32) -> (i32, i32) {
    %c0_i32 = arith.constant 0 : i32
    %c0_i32_0 = arith.constant 0 : i32
    %c0_i32_1 = arith.constant 0 : i32
    return %c0_i32, %c0_i32_0 : i32, i32
  }
  func.func @transform_4(%arg0: i32) -> (i32, i32) {
    %c0_i32 = arith.constant 0 : i32
    %c0_i32_0 = arith.constant 0 : i32
    %c0_i32_1 = arith.constant 0 : i32
    return %c0_i32, %c0_i32_0 : i32, i32
  }
  func.func @transform_5(%arg0: i32) -> (i32, i32) {
    %c0_i32 = arith.constant 0 : i32
    %c0_i32_0 = arith.constant 0 : i32
    %c0_i32_1 = arith.constant 0 : i32
    return %c0_i32, %c0_i32_0 : i32, i32
  }
  func.func @transform_6(%arg0: i32) -> (i32, i32) {
    %c0_i32 = arith.constant 0 : i32
    %c0_i32_0 = arith.constant 0 : i32
    %c0_i32_1 = arith.constant 0 : i32
    return %c0_i32, %c0_i32_0 : i32, i32
  }
  func.func @transform_7(%arg0: i32) -> (i32, i32) {
    %c0_i32 = arith.constant 0 : i32
    %c0_i32_0 = arith.constant 0 : i32
    %c0_i32_1 = arith.constant 0 : i32
    return %c0_i32, %c0_i32_0 : i32, i32
  }
  func.func @transform_8(%arg0: i32) -> (i32, i32) {
    %c0_i32 = arith.constant 0 : i32
    %c0_i32_0 = arith.constant 0 : i32
    %c0_i32_1 = arith.constant 0 : i32
    return %c0_i32, %c0_i32_0 : i32, i32
  }
  func.func @transform_9(%arg0: i32) -> (i32, i32) {
    %c0_i32 = arith.constant 0 : i32
    %c0_i32_0 = arith.constant 0 : i32
    return %arg0, %c0_i32 : i32, i32
  }
}

</mosaic_0001>

<bundles_post_ra>
// kernel: tpu_custom_call.1
= control target key start
LH: loop header
LB: loop body
LE: loop exit
PB: predicated region body
PF: predicated region fallthrough
CT: control target
= control target key end

     0   :  { %s1686_s30 = smov 0   ;;  %s2044_s0 = inlined_call_operand.vmem [shape: f32[256,64], index: 0, kind: input, shape index: {}]   ;;  %s2045_s1 = inlined_call_operand.vmem [shape: bf16[64,256], index: 1, kind: input, shape index: {}]   ;;  %s2046_s2 = inlined_call_operand.vmem [shape: f32[1,256], index: 2, kind: input, shape index: {}]   ;;  %s2047_s3 = inlined_call_operand.vmem [shape: bf16[128,128], index: 3, kind: input, shape index: {}]   ;;  %s2048_s4 = inlined_call_operand.vmem [shape: f32[1,128], index: 4, kind: input, shape index: {}]   ;;  %s2049_s5 = inlined_call_operand.vmem [shape: bf16[128,128], index: 5, kind: input, shape index: {}]   ;;  %s2050_s6 = inlined_call_operand.vmem [shape: f32[1,128], index: 6, kind: input, shape index: {}]   ;;  %s2051_s7 = inlined_call_operand.vmem [shape: bf16[128,12], index: 7, kind: input, shape index: {}]   ;;  %s2052_s8 = inlined_call_operand.vmem [shape: f32[1,12], index: 8, kind: input, shape index: {}]   ;;  %s2053_s9 = inlined_call_operand.vmem [shape: f32[256,12], index: 9, kind: output, shape index: {}]  }
   0x1 LB: > { %s1336_s10 = sadd.s32 4294967295, %s1633_s30   ;;  %p1340_p0 = scmp.ge.s32.totalorder %s1633_s30, 1  ;;  %s1633_s30 = sphi %s1686_s30, %s19_s30  }
   0x2   : > { %p288_p1 = scmp.lt.s32.totalorder %s1633_s30, 3 }
   0x4   : > { %p289_p2 = pnand %p1340_p0, %p288_p1 }
   0x5   : > { %v1559_v0 = vld [vmem:[%s2045_s1 + $0x4] ss:$8 sps:$4 sm:$0xff] (!%p289_p2)   ;;  %s1341_s13 = sshll.u32 (!%p289_p2), %s1336_s10, 4  ;;  %v1561_v1 = vld [vmem:[%s2045_s1] ss:$8 sps:$4 sm:$0xff] (!%p289_p2)   ;;  %v1635_v2 = vmov (!%p289_p2), 0   ;;  %v371_v42 = vlaneseq (!%p289_p2) }
   0x6   : > { %292 = sbr.rel (%p289_p2) target bundleno = 974 (0x3ce), region = 56  ;;  %478 = vmatprep.mubr.bf16.mxu0 (!%p289_p2), %v1635_v2  ;;  %p325_p3 = scmp.lt.s32.totalorder (!%p289_p2), %s1341_s13, 31  ;;  %446 = vmatprep.subr.bf16.mxu0 (!%p289_p2), %v1559_v0  ;;  %v1562_v3 = vld [vmem:[%s2045_s1 + $0x14] ss:$8 sps:$4 sm:$0xff] (!%p289_p2)   ;;  %v1564_v4 = vld [vmem:[%s2045_s1 + $0x10] ss:$8 sps:$4 sm:$0xff] (!%p289_p2)  }
   0x7   : > { %447 = vmatpush1.bf16.msra.mxu0 (!%p289_p2), %v1561_v1  ;;  %v1565_v5 = vld [vmem:[%s2045_s1 + $0x24] ss:$8 sps:$4 sm:$0xff] (!%p289_p2)   ;;  %v1567_v7 = vld [vmem:[%s2045_s1 + $0x20] ss:$8 sps:$4 sm:$0xff] (!%p289_p2)   ;;  %v1568_v8 = vld [vmem:[%s2045_s1 + $0x34] ss:$8 sps:$4 sm:$0xff] (!%p289_p2)  }
   0x8   : > { %448 = vmatprep.subr.bf16.mxu0 (!%p289_p2), %v1562_v3  ;;  %v1571_v6 = vld [vmem:[%s2047_s3] sm:$0xff] (!%p289_p2)   ;;  %v1570_v9 = vld [vmem:[%s2045_s1 + $0x30] ss:$8 sps:$4 sm:$0xff] (!%p289_p2)   ;;  %v1572_v12 = vld [vmem:[%s2047_s3 + $0x8] sm:$0xff] (!%p289_p2)   ;;  %vm421_vm0 = vcmask (!%p289_p2), 523264   ;;  %v1787_v43 = vshrl.u32 (!%p289_p2), %v371_v42, 7 }
   0x9   : > { %1438 = vmatprep.subr.bf16.mxu1 (!%p289_p2), %v1571_v6  ;;  %v1573_v13 = vld [vmem:[%s2047_s3 + $0x10] sm:$0xff] (!%p289_p2)   ;;  %v1574_v15 = vld [vmem:[%s2047_s3 + $0x18] sm:$0xff] (!%p289_p2)   ;;  %v1575_v37 = vld [vmem:[%s2047_s3 + $0x20] sm:$0xff] (!%p289_p2)  }
   0xa   : > { %1439 = vmatpush3.bf16.msra.mxu1 (!%p289_p2), %v1571_v6  ;;  %v1576_v38 = vld [vmem:[%s2047_s3 + $0x28] sm:$0xff] (!%p289_p2)   ;;  %v1577_v39 = vld [vmem:[%s2047_s3 + $0x30] sm:$0xff] (!%p289_p2)   ;;  %v1578_v40 = vld [vmem:[%s2047_s3 + $0x38] sm:$0xff] (!%p289_p2)   ;;  %v377_v44 = vsub.s32 (!%p289_p2), 1, %v1787_v43 }
   0xb   : > { %449 = vmatpush1.bf16.msra.mxu0 (!%p289_p2), %v1564_v4  ;;  %1440 = vmatprep.subr.bf16.mxu1 (!%p289_p2), %v1572_v12  ;;  %v1579_v41 = vld [vmem:[%s2049_s5] sm:$0xff] (!%p289_p2)  }
   0xc   : > { %450 = vmatprep.subr.bf16.mxu0 (!%p289_p2), %v1565_v5  ;;  %v1793_v45 = vld [vmem:[%s2046_s2] sm:$0x3] (!%p289_p2) }
   0xd   : > { %s2055_s13 = smov (!%p325_p3, %s1341_s13), 31  ;;  %v1796_v46 = vrot.slane %v1793_v45, %v377_v44 }
   0xe   : > { %s1342_s22 = sshll.u32 %s2055_s13, 3  ;;  %1441 = vmatpush3.bf16.msra.mxu1 %v1572_v12 }
   0xf   : > { %s1727_s11 = scalar_lea.vmem %s2044_s0, %s1342_s22  ;;  %451 = vmatpush1.bf16.msra.mxu0 %v1567_v7  ;;  %1442 = vmatprep.subr.bf16.mxu1 %v1573_v13  ;;  %v1580_v7 = vld [vmem:[%s2049_s5 + $0x8] sm:$0xff]   ;;  %s2007_s17 = scalar_lea.vmem %s2053_s9, %s1342_s22 }
  0x10   : > { %v337_v10 = vld [vmem:[%s1727_s11] sm:$0xff]  ;;  %v338_v11 = vld [vmem:[%s1727_s11 + $0x8] sm:$0xff]  ;;  %452 = vmatprep.subr.bf16.mxu0 %v1568_v8  ;;  %v339_v16 = vld [vmem:[%s1727_s11 + $0x10] sm:$0xff] }
  0x11   : > { %v353_v14 = vpack.c.bf16 %v338_v11, %v337_v10  ;;  %v340_v17 = vld [vmem:[%s1727_s11 + $0x18] sm:$0xff]  ;;  %v341_v19 = vld [vmem:[%s1727_s11 + $0x20] sm:$0xff]  ;;  %v342_v20 = vld [vmem:[%s1727_s11 + $0x28] sm:$0xff] }
  0x12   : > { %1443 = vmatpush3.bf16.msra.mxu1 %v1573_v13  ;;  %v354_v18 = vpack.c.bf16 %v340_v17, %v339_v16  ;;  %v355_v21 = vpack.c.bf16 %v342_v20, %v341_v19  ;;  %v343_v22 = vld [vmem:[%s1727_s11 + $0x30] sm:$0xff]  ;;  %v344_v23 = vld [vmem:[%s1727_s11 + $0x38] sm:$0xff]  ;;  %v345_v25 = vld [vmem:[%s1727_s11 + $0x40] sm:$0xff] }
  0x13   : > { %453 = vmatpush1.bf16.msra.mxu0 %v1570_v9  ;;  %1444 = vmatprep.subr.bf16.mxu1 %v1574_v15  ;;  %v356_v24 = vpack.c.bf16 %v344_v23, %v343_v22  ;;  %v346_v26 = vld [vmem:[%s1727_s11 + $0x48] sm:$0xff]  ;;  %v347_v28 = vld [vmem:[%s1727_s11 + $0x50] sm:$0xff]  ;;  %v348_v29 = vld [vmem:[%s1727_s11 + $0x58] sm:$0xff] }
  0x14   : > { %v357_v27 = vpack.c.bf16 %v346_v26, %v345_v25  ;;  %v358_v30 = vpack.c.bf16 %v348_v29, %v347_v28  ;;  %v349_v31 = vld [vmem:[%s1727_s11 + $0x60] sm:$0xff]  ;;  %v350_v32 = vld [vmem:[%s1727_s11 + $0x68] sm:$0xff]  ;;  %v351_v34 = vld [vmem:[%s1727_s11 + $0x70] sm:$0xff] }
  0x15   : > { %v359_v33 = vpack.c.bf16 %v350_v32, %v349_v31  ;;  %v352_v35 = vld [vmem:[%s1727_s11 + $0x78] sm:$0xff]  ;;  %v1581_v13 = vld [vmem:[%s2049_s5 + $0x10] sm:$0xff]  }
  0x16   : > { %1353 = vmatmul.mubr.msk.bf16.vlgmr.msra.gmra.mrb[0].mxu0 %vm421_vm0, %v353_v14  ;;  %1445 = vmatpush3.bf16.msra.mxu1 %v1574_v15  ;;  %v360_v36 = vpack.c.bf16 %v352_v35, %v351_v34 }
  0x17   : > { %488 = vmatprep.mubr.bf16.mxu0 %v1635_v2  ;;  %1446 = vmatprep.subr.bf16.mxu1 %v1575_v37 }
  0x1a   : > { %1447 = vmatpush3.bf16.msra.mxu1 %v1575_v37 }
  0x1b   : > { %1448 = vmatprep.subr.bf16.mxu1 %v1576_v38 }
  0x1e   : > { %1354 = vmatmul.mubr.msk.bf16.gmra.mrb[4].mxu0 %vm421_vm0, %v354_v18  ;;  %1449 = vmatpush3.bf16.msra.mxu1 %v1576_v38 }
  0x1f   : > { %498 = vmatprep.mubr.bf16.mxu0 %v1635_v2  ;;  %1450 = vmatprep.subr.bf16.mxu1 %v1577_v39 }
  0x22   : > { %1451 = vmatpush3.bf16.msra.mxu1 %v1577_v39 }
  0x23   : > { %1452 = vmatprep.subr.bf16.mxu1 %v1578_v40 }
  0x26   : > { %1355 = vmatmul.mubr.msk.bf16.gmra.mrb[8].mxu0 %vm421_vm0, %v355_v21  ;;  %1453 = vmatpush3.bf16.msra.mxu1 %v1578_v40 }
  0x27   : > { %508 = vmatprep.mubr.bf16.mxu0 %v1635_v2  ;;  %1470 = vmatprep.subr.bf16.mxu1 %v1579_v41 }
  0x2e   : > { %1356 = vmatmul.mubr.msk.bf16.gmra.mrb[12].mxu0 %vm421_vm0, %v356_v24 }
  0x2f   : > { %518 = vmatprep.mubr.bf16.mxu0 %v1635_v2 }
  0x36   : > { %1357 = vmatmul.mubr.msk.bf16.gmra.mrb[16].mxu0 %vm421_vm0, %v357_v27 }
  0x37   : > { %528 = vmatprep.mubr.bf16.mxu0 %v1635_v2 }
  0x3e   : > { %1358 = vmatmul.mubr.msk.bf16.gmra.mrb[20].mxu0 %vm421_vm0, %v358_v30 }
  0x3f   : > { %538 = vmatprep.mubr.bf16.mxu0 %v1635_v2 }
  0x46   : > { %1359 = vmatmul.mubr.msk.bf16.gmra.mrb[24].mxu0 %vm421_vm0, %v359_v33 }
  0x47   : > { %548 = vmatprep.mubr.bf16.mxu0 %v1635_v2 }
  0x4e   : > { %1360 = vmatmul.mubr.msk.bf16.gmra.mrb[28].mxu0 %vm421_vm0, %v360_v36 }
  0xe9   : > { %v1798_v47 = vpop.f32.mrb[0].mxu0 }
  0xea   : > { %v482_v48 = vpop.f32.mrb[1].mxu0 }
  0xeb   : > { %v483_v49 = vadd.f32 %v482_v48, %v1796_v46  ;;  %v1801_v50 = vpop.f32.mrb[2].mxu0 }
  0xec   : > { %v486_v51 = vpop.f32.mrb[3].mxu0 }
  0xed   : > { %v592_v52 = vmul.f32 0.01, %v483_v49  ;;  %v487_v53 = vadd.f32 %v486_v51, %v1796_v46  ;;  %vm560_vm1 = vcmp.gt.f32.partialorder %v483_v49, 0.0 }
  0xef   : > { %v594_v54 = vmul.f32 0.01, %v487_v53  ;;  %vm562_vm2 = vcmp.gt.f32.partialorder %v487_v53, 0.0  ;;  %v624_v56 = vsel %vm560_vm1, %v483_v49, %v592_v52 }
  0xf1   : > { %v1804_v55 = vpop.f32.mrb[4].mxu0  ;;  %v626_v57 = vsel %vm562_vm2, %v487_v53, %v594_v54 }
  0xf2   : > { %v492_v58 = vpop.f32.mrb[5].mxu0  ;;  %v655_v59 = vpack.c.bf16 %v626_v57, %v624_v56 }
  0xf3   : > { %v493_v60 = vadd.f32 %v492_v58, %v1796_v46  ;;  %v1807_v61 = vpop.f32.mrb[6].mxu0 }
  0xf4   : > { %v496_v62 = vpop.f32.mrb[7].mxu0  ;;  %1454 = vmatprep.mubr.bf16.mxu1 %v655_v59 }
  0xf5   : > { %v596_v63 = vmul.f32 0.01, %v493_v60  ;;  %v497_v0 = vadd.f32 %v496_v62, %v1796_v46  ;;  %vm564_vm3 = vcmp.gt.f32.partialorder %v493_v60, 0.0 }
  0xf7   : > { %vm566_vm4 = vcmp.gt.f32.partialorder %v497_v0, 0.0  ;;  %v598_v1 = vmul.f32 0.01, %v497_v0  ;;  %v628_v3 = vsel %vm564_vm3, %v493_v60, %v596_v63 }
  0xf9   : > { %v1810_v2 = vpop.f32.mrb[8].mxu0  ;;  %v630_v4 = vsel %vm566_vm4, %v497_v0, %v598_v1 }
  0xfa   : > { %v502_v5 = vpop.f32.mrb[9].mxu0  ;;  %v656_v6 = vpack.c.bf16 %v630_v4, %v628_v3 }
  0xfb   : > { %v503_v8 = vadd.f32 %v502_v5, %v1796_v46  ;;  %v1816_v9 = vpop.f32.mrb[10].mxu0 }
  0xfc   : > { %v506_v10 = vpop.f32.mrb[11].mxu0  ;;  %1455 = vmatmul.mubr.bf16.vlgmr.msra.gmra.mrb[0].mxu1 %v656_v6 }
  0xfd   : > { %v600_v11 = vmul.f32 0.01, %v503_v8  ;;  %v507_v12 = vadd.f32 %v506_v10, %v1796_v46  ;;  %1471 = vmatpush3.bf16.msra.mxu1 %v1579_v41  ;;  %vm568_vm5 = vcmp.gt.f32.partialorder %v503_v8, 0.0 }
  0xfe   : > { %1472 = vmatprep.subr.bf16.mxu1 %v1580_v7 }
  0xff   : > { %vm570_vm6 = vcmp.gt.f32.partialorder %v507_v12, 0.0  ;;  %v602_v14 = vmul.f32 0.01, %v507_v12  ;;  %v632_v16 = vsel %vm568_vm5, %v503_v8, %v600_v11 }
 0x101   : > { %v1822_v15 = vpop.f32.mrb[12].mxu0  ;;  %v634_v17 = vsel %vm570_vm6, %v507_v12, %v602_v14  ;;  %1473 = vmatpush3.bf16.msra.mxu1 %v1580_v7 }
 0x102   : > { %v512_v18 = vpop.f32.mrb[13].mxu0  ;;  %v657_v19 = vpack.c.bf16 %v634_v17, %v632_v16  ;;  %1474 = vmatprep.subr.bf16.mxu1 %v1581_v13 }
 0x103   : > { %v513_v20 = vadd.f32 %v512_v18, %v1796_v46  ;;  %v1825_v21 = vpop.f32.mrb[14].mxu0 }
 0x104   : > { %v516_v22 = vpop.f32.mrb[15].mxu0  ;;  %1458 = vmatprep.mubr.bf16.mxu1 %v657_v19  ;;  %v1582_v19 = vld [vmem:[%s2049_s5 + $0x18] sm:$0xff]  }
 0x105   : > { %v604_v23 = vmul.f32 0.01, %v513_v20  ;;  %v517_v24 = vadd.f32 %v516_v22, %v1796_v46  ;;  %1475 = vmatpush3.bf16.msra.mxu1 %v1581_v13  ;;  %vm572_vm7 = vcmp.gt.f32.partialorder %v513_v20, 0.0  ;;  %v1585_v22 = vld [vmem:[%s2049_s5 + $0x30] sm:$0xff]  }
 0x106   : > { %1476 = vmatprep.subr.bf16.mxu1 %v1582_v19 }
 0x107   : > { %vm574_vm8 = vcmp.gt.f32.partialorder %v517_v24, 0.0  ;;  %v606_v25 = vmul.f32 0.01, %v517_v24  ;;  %v636_v27 = vsel %vm572_vm7, %v513_v20, %v604_v23  ;;  %v1583_v20 = vld [vmem:[%s2049_s5 + $0x20] sm:$0xff]   ;;  %v1586_v23 = vld [vmem:[%s2049_s5 + $0x38] sm:$0xff]  }
 0x109   : > { %v1828_v26 = vpop.f32.mrb[16].mxu0  ;;  %v638_v28 = vsel %vm574_vm8, %v517_v24, %v606_v25  ;;  %1477 = vmatpush3.bf16.msra.mxu1 %v1582_v19  ;;  %v1870_v24 = vld [vmem:[%s2051_s7] sm:$0xff]   ;;  %v1875_v25 = vld [vmem:[%s2051_s7 + $0x8] sm:$0xff]  }
 0x10a   : > { %v522_v29 = vpop.f32.mrb[17].mxu0  ;;  %v658_v30 = vpack.c.bf16 %v638_v28, %v636_v27  ;;  %1478 = vmatprep.subr.bf16.mxu1 %v1583_v20  ;;  %1502 = vmatprep.subr.bf16.mxu0 %v1870_v24  ;;  %v1884_v27 = vld [vmem:[%s2051_s7 + $0x10] sm:$0xff]   ;;  %v1891_v28 = vld [vmem:[%s2051_s7 + $0x18] sm:$0xff]  }
 0x10b   : > { %v523_v31 = vadd.f32 %v522_v29, %v1796_v46  ;;  %v1831_v32 = vpop.f32.mrb[18].mxu0  ;;  %1503 = vmatpush3.bf16.msra.mxu0 %v1870_v24  ;;  %v1898_v29 = vld [vmem:[%s2051_s7 + $0x20] sm:$0xff]  }
 0x10c   : > { %v526_v33 = vpop.f32.mrb[19].mxu0  ;;  %1459 = vmatmul.mubr.bf16.gmra.mrb[4].mxu1 %v658_v30  ;;  %1504 = vmatprep.subr.bf16.mxu0 %v1875_v25  ;;  %v373_v30 = vsub.s32 0, %v1787_v43 }
 0x10d   : > { %v608_v34 = vmul.f32 0.01, %v523_v31  ;;  %v527_v35 = vadd.f32 %v526_v33, %v1796_v46  ;;  %vm576_vm9 = vcmp.gt.f32.partialorder %v523_v31, 0.0  ;;  %1479 = vmatpush3.bf16.msra.mxu1 %v1583_v20 }
 0x10f   : > { %vm578_vm10 = vcmp.gt.f32.partialorder %v527_v35, 0.0  ;;  %v610_v36 = vmul.f32 0.01, %v527_v35  ;;  %v640_v38 = vsel %vm576_vm9, %v523_v31, %v608_v34  ;;  %1505 = vmatpush3.bf16.msra.mxu0 %v1875_v25  ;;  %v1907_v31 = vld [vmem:[%s2048_s4] ss:$0 sm:$0xff] }
 0x110   : > { %1506 = vmatprep.subr.bf16.mxu0 %v1884_v27 }
 0x111   : > { %v1834_v37 = vpop.f32.mrb[20].mxu0  ;;  %v642_v39 = vsel %vm578_vm10, %v527_v35, %v610_v36  ;;  %v1911_v36 = vrot.slane %v1793_v45, %v373_v30 }
 0x112   : > { %v532_v40 = vpop.f32.mrb[21].mxu0  ;;  %v659_v41 = vpack.c.bf16 %v642_v39, %v640_v38 }
 0x113   : > { %v533_v42 = vadd.f32 %v532_v40, %v1796_v46  ;;  %v1837_v44 = vpop.f32.mrb[22].mxu0  ;;  %1507 = vmatpush3.bf16.msra.mxu0 %v1884_v27  ;;  %v495_v45 = vadd.f32 %v1807_v61, %v1911_v36  ;;  %v501_v19 = vadd.f32 %v1810_v2, %v1911_v36  ;;  %v515_v20 = vadd.f32 %v1825_v21, %v1911_v36 }
 0x114   : > { %v536_v48 = vpop.f32.mrb[23].mxu0  ;;  %1462 = vmatprep.mubr.bf16.mxu1 %v659_v41  ;;  %1508 = vmatprep.subr.bf16.mxu0 %v1891_v28 }
 0x115   : > { %v612_v49 = vmul.f32 0.01, %v533_v42  ;;  %v537_v51 = vadd.f32 %v536_v48, %v1796_v46  ;;  %vm580_vm11 = vcmp.gt.f32.partialorder %v533_v42, 0.0  ;;  %v481_v48 = vadd.f32 %v1798_v47, %v1911_v36 }
 0x116   : > { %vm565_vm3 = vcmp.gt.f32.partialorder %v495_v45, 0.0  ;;  %vm567_vm6 = vcmp.gt.f32.partialorder %v501_v19, 0.0  ;;  %vm573_vm7 = vcmp.gt.f32.partialorder %v515_v20, 0.0 }
 0x117   : > { %vm582_vm12 = vcmp.gt.f32.partialorder %v537_v51, 0.0  ;;  %v614_v52 = vmul.f32 0.01, %v537_v51  ;;  %v644_v54 = vsel %vm580_vm11, %v533_v42, %v612_v49  ;;  %1509 = vmatpush3.bf16.msra.mxu0 %v1891_v28  ;;  %v491_v42 = vadd.f32 %v1804_v55, %v1911_v36 }
 0x118   : > { %1510 = vmatprep.subr.bf16.mxu0 %v1898_v29  ;;  %v485_v49 = vadd.f32 %v1801_v50, %v1911_v36  ;;  %vm559_vm2 = vcmp.gt.f32.partialorder %v481_v48, 0.0 }
 0x119   : > { %v1840_v53 = vpop.f32.mrb[24].mxu0  ;;  %v646_v56 = vsel %vm582_vm12, %v537_v51, %v614_v52  ;;  %v595_v51 = vmul.f32 0.01, %v491_v42  ;;  %v591_v52 = vmul.f32 0.01, %v481_v48  ;;  %vm563_vm1 = vcmp.gt.f32.partialorder %v491_v42, 0.0 }
 0x11a   : > { %v542_v57 = vpop.f32.mrb[25].mxu0  ;;  %v660_v58 = vpack.c.bf16 %v646_v56, %v644_v54  ;;  %v597_v54 = vmul.f32 0.01, %v495_v45  ;;  %v593_v56 = vmul.f32 0.01, %v485_v49  ;;  %vm561_vm4 = vcmp.gt.f32.partialorder %v485_v49, 0.0 }
 0x11b   : > { %v543_v59 = vadd.f32 %v542_v57, %v1796_v46  ;;  %v1843_v60 = vpop.f32.mrb[26].mxu0  ;;  %1511 = vmatpush3.bf16.msra.mxu0 %v1898_v29  ;;  %v627_v55 = vsel %vm563_vm1, %v491_v42, %v595_v51 }
 0x11c   : > { %v546_v62 = vpop.f32.mrb[27].mxu0  ;;  %1463 = vmatmul.mubr.bf16.gmra.mrb[8].mxu1 %v660_v58 }
 0x11d   : > { %v616_v63 = vmul.f32 0.01, %v543_v59  ;;  %v547_v0 = vadd.f32 %v546_v62, %v1796_v46  ;;  %vm584_vm13 = vcmp.gt.f32.partialorder %v543_v59, 0.0 }
 0x11f   : > { %vm586_vm14 = vcmp.gt.f32.partialorder %v547_v0, 0.0  ;;  %v618_v1 = vmul.f32 0.01, %v547_v0  ;;  %v648_v4 = vsel %vm584_vm13, %v543_v59, %v616_v63  ;;  %v623_v59 = vsel %vm559_vm2, %v481_v48, %v591_v52 }
 0x120   : > { %v629_v63 = vsel %vm565_vm3, %v495_v45, %v597_v54 }
 0x121   : > { %v1846_v3 = vpop.f32.mrb[28].mxu0  ;;  %v650_v5 = vsel %vm586_vm14, %v547_v0, %v618_v1  ;;  %v625_v1 = vsel %vm561_vm4, %v485_v49, %v593_v56 }
 0x122   : > { %v552_v6 = vpop.f32.mrb[29].mxu0  ;;  %v661_v7 = vpack.c.bf16 %v650_v5, %v648_v4 }
 0x123   : > { %v553_v8 = vadd.f32 %v552_v6, %v1796_v46  ;;  %v1849_v10 = vpop.f32.mrb[30].mxu0 }
 0x124   : > { %v556_v11 = vpop.f32.mrb[31].mxu0  ;;  %1466 = vmatprep.mubr.bf16.mxu1 %v661_v7 }
 0x125   : > { %v620_v12 = vmul.f32 0.01, %v553_v8  ;;  %v557_v13 = vadd.f32 %v556_v11, %v1796_v46  ;;  %vm588_vm15 = vcmp.gt.f32.partialorder %v553_v8, 0.0  ;;  %v1584_v46 = vld [vmem:[%s2049_s5 + $0x28] sm:$0xff]  }
 0x126   : > { %1480 = vmatprep.subr.bf16.mxu1 %v1584_v46 }
 0x127   : > { %vm590_vm0 = vcmp.gt.f32.partialorder %v557_v13, 0.0  ;;  %v622_v14 = vmul.f32 0.01, %v557_v13  ;;  %v652_v16 = vsel %vm588_vm15, %v553_v8, %v620_v12  ;;  %1481 = vmatpush3.bf16.msra.mxu1 %v1584_v46  ;;  %v505_v46 = vadd.f32 %v1816_v9, %v1911_v36 }
 0x128   : > { %1482 = vmatprep.subr.bf16.mxu1 %v1585_v22 }
 0x129   : > { %v654_v17 = vsel %vm590_vm0, %v557_v13, %v622_v14  ;;  %v601_v2 = vmul.f32 0.01, %v505_v46  ;;  %vm569_vm8 = vcmp.gt.f32.partialorder %v505_v46, 0.0 }
 0x12a   : > { %v662_v18 = vpack.c.bf16 %v654_v17, %v652_v16 }
 0x12b   : > { %1483 = vmatpush3.bf16.msra.mxu1 %v1585_v22 }
 0x12c   : > { %1467 = vmatmul.mubr.bf16.gmra.mrb[12].mxu1 %v662_v18  ;;  %1484 = vmatprep.subr.bf16.mxu1 %v1586_v23  ;;  %v511_v18 = vadd.f32 %v1822_v15, %v1911_v36  ;;  %v605_v15 = vmul.f32 0.01, %v515_v20 }
 0x12e   : > { %v603_v22 = vmul.f32 0.01, %v511_v18  ;;  %vm571_vm5 = vcmp.gt.f32.partialorder %v511_v18, 0.0 }
 0x12f   : > { %1485 = vmatpush3.bf16.msra.mxu1 %v1586_v23  ;;  %v599_v23 = vmul.f32 0.01, %v501_v19 }
 0x130   : > { %1534 = vmatprep.subr.bf16.mxu1 %v1870_v24  ;;  %v635_v21 = vsel %vm571_vm5, %v511_v18, %v603_v22  ;;  %v555_v22 = vadd.f32 %v1849_v10, %v1911_v36 }
 0x132   : > { %vm589_vm15 = vcmp.gt.f32.partialorder %v555_v22, 0.0 }
 0x1cf   : > { %v1456_v33 = vpop.f32.mrb[0].mxu1 }
 0x1d0   : > { %v777_v34 = vadd.f32 %v1456_v33, %v1907_v31  ;;  %v768_v35 = vpop.f32.mrb[1].mxu1  ;;  %v631_v33 = vsel %vm567_vm6, %v501_v19, %v599_v23  ;;  %v545_v23 = vadd.f32 %v1843_v60, %v1911_v36 }
 0x1d1   : > { %v769_v38 = vadd.f32 %v1907_v31, %v768_v35  ;;  %v1457_v39 = vpop.f32.mrb[2].mxu1  ;;  %v637_v35 = vsel %vm573_vm7, %v515_v20, %v605_v15  ;;  %v551_v20 = vadd.f32 %v1846_v3, %v1911_v36 }
 0x1d2   : > { %1595 = vtanh.f32 %v777_v34  ;;  %v780_v40 = vadd.f32 %v1457_v39, %v1907_v31  ;;  %v771_v41 = vpop.f32.mrb[3].mxu1  ;;  %vm585_vm0 = vcmp.gt.f32.partialorder %v545_v23, 0.0 }
 0x1d3   : > { %1597 = vtanh.f32 %v769_v38  ;;  %v772_v43 = vadd.f32 %v1907_v31, %v771_v41  ;;  %v619_v15 = vmul.f32 0.01, %v551_v20  ;;  %vm587_vm13 = vcmp.gt.f32.partialorder %v551_v20, 0.0 }
 0x1d4   : > { %1599 = vtanh.f32 %v780_v40  ;;  %v633_v40 = vsel %vm569_vm8, %v505_v46, %v601_v2  ;;  %v541_v46 = vadd.f32 %v1840_v53, %v1911_v36 }
 0x1d5   : > { %1601 = vtanh.f32 %v772_v43 }
 0x1d6   : > { %v615_v2 = vmul.f32 0.01, %v541_v46  ;;  %vm583_vm14 = vcmp.gt.f32.partialorder %v541_v46, 0.0 }
 0x1d8   : > { %v647_v53 = vsel %vm583_vm14, %v541_v46, %v615_v2 }
 0x1dc   : > { %v1596_v57 = vpop.eup %1595 }
 0x1dd   : > { %v1598_v58 = vpop.eup %1597  ;;  %v849_v47 = vmul.f32 %v1596_v57, %v627_v55  ;;  %v531_v57 = vadd.f32 %v1834_v37, %v1911_v36  ;;  %v521_v55 = vadd.f32 %v1828_v26, %v1911_v36 }
 0x1de   : > { %v1600_v62 = vpop.eup %1599  ;;  %v847_v0 = vmul.f32 %v1598_v58, %v623_v59  ;;  %v535_v58 = vadd.f32 %v1837_v44, %v1911_v36 }
 0x1df   : > { %v1602_v61 = vpop.eup %1601  ;;  %v850_v4 = vmul.f32 %v1600_v62, %v629_v63  ;;  %v1460_v50 = vpop.f32.mrb[4].mxu1  ;;  %v611_v59 = vmul.f32 0.01, %v531_v57  ;;  %vm579_vm9 = vcmp.gt.f32.partialorder %v531_v57, 0.0  ;;  %vm575_vm10 = vcmp.gt.f32.partialorder %v521_v55, 0.0 }
 0x1e0   : > { %v793_v5 = vadd.f32 %v1460_v50, %v1907_v31  ;;  %v784_v6 = vpop.f32.mrb[5].mxu1  ;;  %v848_v7 = vmul.f32 %v1602_v61, %v625_v1  ;;  %v613_v37 = vmul.f32 0.01, %v535_v58  ;;  %vm581_vm11 = vcmp.gt.f32.partialorder %v535_v58, 0.0 }
 0x1e1   : > { %v785_v8 = vadd.f32 %v1907_v31, %v784_v6  ;;  %v1461_v11 = vpop.f32.mrb[6].mxu1  ;;  %v864_v12 = vpack.c.bf16 %v850_v4, %v849_v47  ;;  %v607_v47 = vmul.f32 0.01, %v521_v55  ;;  %v643_v26 = vsel %vm579_vm9, %v531_v57, %v611_v59 }
 0x1e2   : > { %1603 = vtanh.f32 %v793_v5  ;;  %v796_v13 = vadd.f32 %v1461_v11, %v1907_v31  ;;  %v787_v14 = vpop.f32.mrb[7].mxu1  ;;  %v863_v16 = vpack.c.bf16 %v848_v7, %v847_v0  ;;  %v645_v44 = vsel %vm581_vm11, %v535_v58, %v613_v37 }
 0x1e3   : > { %1605 = vtanh.f32 %v785_v8  ;;  %v788_v17 = vadd.f32 %v1907_v31, %v787_v14  ;;  %v639_v61 = vsel %vm575_vm10, %v521_v55, %v607_v47 }
 0x1e4   : > { %1607 = vtanh.f32 %v796_v13  ;;  %1486 = vmatprep.mubr.bf16.mxu1 %v863_v16 }
 0x1e5   : > { %1609 = vtanh.f32 %v788_v17  ;;  %1487 = vmatmul.mubr.bf16.vlgmr.msra.gmra.mrb[16].mxu1 %v864_v12 }
 0x1e6   : > { %1542 = vmatpush3.bf16.msra.mxu1 %v1870_v24 }
 0x1e7   : > { %1535 = vmatprep.subr.bf16.mxu1 %v1875_v25 }
 0x1ea   : > { %1543 = vmatpush3.bf16.msra.mxu1 %v1875_v25 }
 0x1eb   : > { %1536 = vmatprep.subr.bf16.mxu1 %v1884_v27 }
 0x1ec   : > { %v1604_v30 = vpop.eup %1603 }
 0x1ed   : > { %v1606_v24 = vpop.eup %1605  ;;  %v853_v34 = vmul.f32 %v1604_v30, %v635_v21  ;;  %v617_v30 = vmul.f32 0.01, %v545_v23  ;;  %v651_v21 = vsel %vm587_vm13, %v551_v20, %v619_v15 }
 0x1ee   : > { %v1608_v9 = vpop.eup %1607  ;;  %v851_v38 = vmul.f32 %v1606_v24, %v631_v33  ;;  %1544 = vmatpush3.bf16.msra.mxu1 %v1884_v27 }
 0x1ef   : > { %v1610_v39 = vpop.eup %1609  ;;  %v1464_v41 = vpop.f32.mrb[8].mxu1  ;;  %v854_v43 = vmul.f32 %v1608_v9, %v637_v35  ;;  %1537 = vmatprep.subr.bf16.mxu1 %v1891_v28 }
 0x1f0   : > { %v809_v25 = vadd.f32 %v1464_v41, %v1907_v31  ;;  %v800_v42 = vpop.f32.mrb[9].mxu1  ;;  %v852_v48 = vmul.f32 %v1610_v39, %v633_v40  ;;  %v1592_v41 = vld [vmem:[%s2051_s7 + $0x28] sm:$0xff]  }
 0x1f1   : > { %v801_v45 = vadd.f32 %v1907_v31, %v800_v42  ;;  %v1465_v49 = vpop.f32.mrb[10].mxu1  ;;  %v866_v51 = vpack.c.bf16 %v854_v43, %v853_v34  ;;  %1512 = vmatprep.subr.bf16.mxu0 %v1592_v41  ;;  %v1593_v43 = vld [vmem:[%s2051_s7 + $0x30] sm:$0xff]   ;;  %v1981_v42 = vld [vmem:[%s2050_s6] ss:$0 sm:$0xff] }
 0x1f2   : > { %1611 = vtanh.f32 %v809_v25  ;;  %v812_v52 = vadd.f32 %v1465_v49, %v1907_v31  ;;  %v803_v54 = vpop.f32.mrb[11].mxu1  ;;  %v865_v56 = vpack.c.bf16 %v852_v48, %v851_v38  ;;  %1545 = vmatpush3.bf16.msra.mxu1 %v1891_v28  ;;  %v525_v28 = vadd.f32 %v1831_v32, %v1911_v36  ;;  %1513 = vmatpush3.bf16.msra.mxu0 %v1592_v41  ;;  %v1594_v25 = vld [vmem:[%s2051_s7 + $0x38] sm:$0xff]  }
 0x1f3   : > { %1613 = vtanh.f32 %v801_v45  ;;  %v804_v27 = vadd.f32 %v1907_v31, %v803_v54  ;;  %1538 = vmatprep.subr.bf16.mxu1 %v1898_v29  ;;  %v649_v38 = vsel %vm585_vm0, %v545_v23, %v617_v30  ;;  %1514 = vmatprep.subr.bf16.mxu0 %v1593_v43 }
 0x1f4   : > { %1615 = vtanh.f32 %v812_v52  ;;  %1490 = vmatprep.mubr.bf16.mxu1 %v865_v56  ;;  %v609_v62 = vmul.f32 0.01, %v525_v28  ;;  %vm577_vm12 = vcmp.gt.f32.partialorder %v525_v28, 0.0 }
 0x1f5   : > { %1617 = vtanh.f32 %v804_v27  ;;  %1491 = vmatmul.mubr.bf16.gmra.mrb[20].mxu1 %v866_v51 }
 0x1f6   : > { %1546 = vmatpush3.bf16.msra.mxu1 %v1898_v29  ;;  %v641_v5 = vsel %vm577_vm12, %v525_v28, %v609_v62  ;;  %1515 = vmatpush3.bf16.msra.mxu0 %v1593_v43 }
 0x1f7   : > { %1539 = vmatprep.subr.bf16.mxu1 %v1592_v41  ;;  %1516 = vmatprep.subr.bf16.mxu0 %v1594_v25 }
 0x1fa   : > { %1547 = vmatpush3.bf16.msra.mxu1 %v1592_v41  ;;  %1517 = vmatpush3.bf16.msra.mxu0 %v1594_v25 }
 0x1fb   : > { %1540 = vmatprep.subr.bf16.mxu1 %v1593_v43 }
 0x1fc   : > { %v1612_v63 = vpop.eup %1611 }
 0x1fd   : > { %v1614_v0 = vpop.eup %1613  ;;  %v857_v1 = vmul.f32 %v1612_v63, %v643_v26 }
 0x1fe   : > { %v1616_v4 = vpop.eup %1615  ;;  %v855_v50 = vmul.f32 %v1614_v0, %v639_v61  ;;  %1548 = vmatpush3.bf16.msra.mxu1 %v1593_v43 }
 0x1ff   : > { %v1618_v29 = vpop.eup %1617  ;;  %v1468_v6 = vpop.f32.mrb[12].mxu1  ;;  %v858_v32 = vmul.f32 %v1616_v4, %v645_v44  ;;  %1541 = vmatprep.subr.bf16.mxu1 %v1594_v25 }
 0x200   : > { %v825_v7 = vadd.f32 %v1468_v6, %v1907_v31  ;;  %v816_v8 = vpop.f32.mrb[13].mxu1  ;;  %v856_v11 = vmul.f32 %v1618_v29, %v641_v5 }
 0x201   : > { %v817_v12 = vadd.f32 %v1907_v31, %v816_v8  ;;  %v1469_v13 = vpop.f32.mrb[14].mxu1  ;;  %v868_v14 = vpack.c.bf16 %v858_v32, %v857_v1 }
 0x202   : > { %1619 = vtanh.f32 %v825_v7  ;;  %v828_v16 = vadd.f32 %v1469_v13, %v1907_v31  ;;  %v819_v17 = vpop.f32.mrb[15].mxu1  ;;  %v867_v18 = vpack.c.bf16 %v856_v11, %v855_v50  ;;  %1549 = vmatpush3.bf16.msra.mxu1 %v1594_v25 }
 0x203   : > { %1621 = vtanh.f32 %v817_v12  ;;  %v820_v19 = vadd.f32 %v1907_v31, %v819_v17  ;;  %v621_v31 = vmul.f32 0.01, %v555_v22 }
 0x204   : > { %1623 = vtanh.f32 %v828_v16  ;;  %1494 = vmatprep.mubr.bf16.mxu1 %v867_v18 }
 0x205   : > { %1625 = vtanh.f32 %v820_v19  ;;  %1495 = vmatmul.mubr.bf16.gmra.mrb[24].mxu1 %v868_v14  ;;  %v653_v9 = vsel %vm589_vm15, %v555_v22, %v621_v31 }
 0x20c   : > { %v1620_v3 = vpop.eup %1619 }
 0x20d   : > { %v1622_v24 = vpop.eup %1621  ;;  %v861_v33 = vmul.f32 %v1620_v3, %v651_v21 }
 0x20e   : > { %v1624_v34 = vpop.eup %1623  ;;  %v859_v35 = vmul.f32 %v1622_v24, %v647_v53 }
 0x20f   : > { %v1626_v10 = vpop.eup %1625  ;;  %v862_v39 = vmul.f32 %v1624_v34, %v653_v9 }
 0x210   : > { %v860_v60 = vmul.f32 %v1626_v10, %v649_v38 }
 0x211   : > { %v870_v36 = vpack.c.bf16 %v862_v39, %v861_v33 }
 0x212   : > { %v869_v40 = vpack.c.bf16 %v860_v60, %v859_v35 }
 0x214   : > { %1498 = vmatprep.mubr.bf16.mxu1 %v869_v40 }
 0x215   : > { %1499 = vmatmul.mubr.bf16.gmra.mrb[28].mxu1 %v870_v36 }
 0x2b8   : > { %v1488_v48 = vpop.f32.mrb[16].mxu1 }
 0x2b9   : > { %v985_v45 = vadd.f32 %v1488_v48, %v1981_v42  ;;  %v976_v49 = vpop.f32.mrb[17].mxu1 }
 0x2ba   : > { %v977_v51 = vadd.f32 %v1981_v42, %v976_v49  ;;  %v1489_v52 = vpop.f32.mrb[18].mxu1 }
 0x2bb   : > { %v1057_v54 = vmul.f32 0.01, %v985_v45  ;;  %v988_v56 = vadd.f32 %v1489_v52, %v1981_v42  ;;  %v979_v27 = vpop.f32.mrb[19].mxu1  ;;  %vm1041_vm1 = vcmp.gt.f32.partialorder %v985_v45, 0.0 }
 0x2bc   : > { %v1055_v57 = vmul.f32 0.01, %v977_v51  ;;  %v980_v55 = vadd.f32 %v1981_v42, %v979_v27  ;;  %vm1039_vm2 = vcmp.gt.f32.partialorder %v977_v51, 0.0 }
 0x2bd   : > { %vm1042_vm3 = vcmp.gt.f32.partialorder %v988_v56, 0.0  ;;  %v1058_v58 = vmul.f32 0.01, %v988_v56  ;;  %v1073_v59 = vsel %vm1041_vm1, %v985_v45, %v1057_v54  ;;  %vm1263_vm1 = vcmask 97280  }
 0x2be   : > { %vm1040_vm4 = vcmp.gt.f32.partialorder %v980_v55, 0.0  ;;  %v1056_v28 = vmul.f32 0.01, %v980_v55  ;;  %v1071_v62 = vsel %vm1039_vm2, %v977_v51, %v1055_v57 }
 0x2bf   : > { %v1074_v47 = vsel %vm1042_vm3, %v988_v56, %v1058_v58 }
 0x2c0   : > { %v1088_v37 = vpack.c.bf16 %v1074_v47, %v1073_v59  ;;  %v1072_v63 = vsel %vm1040_vm4, %v980_v55, %v1056_v28  ;;  %v1379_v55 = vld [vmem:[%s2052_s8] ss:$0 sm:$0xff] }
 0x2c1   : > { %v1087_v26 = vpack.c.bf16 %v1072_v63, %v1071_v62 }
 0x2c3   : > { %1518 = vmatprep.mubr.bf16.mxu0 %v1087_v26 }
 0x2c4   : > { %1519 = vmatmul.mubr.bf16.vlgmr.msra.gmra.mrb[32].mxu0 %v1088_v37 }
 0x2c8   : > { %v1492_v0 = vpop.f32.mrb[20].mxu1 }
 0x2c9   : > { %v1001_v61 = vadd.f32 %v1492_v0, %v1981_v42  ;;  %v992_v1 = vpop.f32.mrb[21].mxu1 }
 0x2ca   : > { %v993_v4 = vadd.f32 %v1981_v42, %v992_v1  ;;  %v1493_v44 = vpop.f32.mrb[22].mxu1 }
 0x2cb   : > { %v1061_v50 = vmul.f32 0.01, %v1001_v61  ;;  %v1004_v29 = vadd.f32 %v1493_v44, %v1981_v42  ;;  %v995_v5 = vpop.f32.mrb[23].mxu1  ;;  %vm1045_vm5 = vcmp.gt.f32.partialorder %v1001_v61, 0.0 }
 0x2cc   : > { %v1059_v6 = vmul.f32 0.01, %v993_v4  ;;  %v996_v32 = vadd.f32 %v1981_v42, %v995_v5  ;;  %vm1043_vm6 = vcmp.gt.f32.partialorder %v993_v4, 0.0 }
 0x2cd   : > { %vm1046_vm7 = vcmp.gt.f32.partialorder %v1004_v29, 0.0  ;;  %v1062_v7 = vmul.f32 0.01, %v1004_v29  ;;  %v1077_v11 = vsel %vm1045_vm5, %v1001_v61, %v1061_v50 }
 0x2ce   : > { %vm1044_vm8 = vcmp.gt.f32.partialorder %v996_v32, 0.0  ;;  %v1060_v8 = vmul.f32 0.01, %v996_v32  ;;  %v1075_v13 = vsel %vm1043_vm6, %v993_v4, %v1059_v6 }
 0x2cf   : > { %v1078_v12 = vsel %vm1046_vm7, %v1004_v29, %v1062_v7 }
 0x2d0   : > { %v1076_v14 = vsel %vm1044_vm8, %v996_v32, %v1060_v8  ;;  %v1090_v16 = vpack.c.bf16 %v1078_v12, %v1077_v11 }
 0x2d1   : > { %v1089_v17 = vpack.c.bf16 %v1076_v14, %v1075_v13 }
 0x2d3   : > { %1522 = vmatprep.mubr.bf16.mxu0 %v1089_v17 }
 0x2d4   : > { %1523 = vmatmul.mubr.bf16.gmra.mrb[36].mxu0 %v1090_v16 }
 0x2d8   : > { %v1496_v18 = vpop.f32.mrb[24].mxu1 }
 0x2d9   : > { %v1017_v19 = vadd.f32 %v1496_v18, %v1981_v42  ;;  %v1008_v20 = vpop.f32.mrb[25].mxu1 }
 0x2da   : > { %v1009_v46 = vadd.f32 %v1981_v42, %v1008_v20  ;;  %v1497_v22 = vpop.f32.mrb[26].mxu1 }
 0x2db   : > { %v1065_v23 = vmul.f32 0.01, %v1017_v19  ;;  %v1020_v15 = vadd.f32 %v1497_v22, %v1981_v42  ;;  %v1011_v2 = vpop.f32.mrb[27].mxu1  ;;  %vm1049_vm9 = vcmp.gt.f32.partialorder %v1017_v19, 0.0 }
 0x2dc   : > { %v1063_v31 = vmul.f32 0.01, %v1009_v46  ;;  %v1012_v30 = vadd.f32 %v1981_v42, %v1011_v2  ;;  %vm1047_vm10 = vcmp.gt.f32.partialorder %v1009_v46, 0.0 }
 0x2dd   : > { %vm1050_vm11 = vcmp.gt.f32.partialorder %v1020_v15, 0.0  ;;  %v1066_v3 = vmul.f32 0.01, %v1020_v15  ;;  %v1081_v24 = vsel %vm1049_vm9, %v1017_v19, %v1065_v23 }
 0x2de   : > { %vm1048_vm12 = vcmp.gt.f32.partialorder %v1012_v30, 0.0  ;;  %v1064_v21 = vmul.f32 0.01, %v1012_v30  ;;  %v1079_v33 = vsel %vm1047_vm10, %v1009_v46, %v1063_v31 }
 0x2df   : > { %v1082_v53 = vsel %vm1050_vm11, %v1020_v15, %v1066_v3 }
 0x2e0   : > { %v1080_v34 = vsel %vm1048_vm12, %v1012_v30, %v1064_v21  ;;  %v1092_v9 = vpack.c.bf16 %v1082_v53, %v1081_v24 }
 0x2e1   : > { %v1091_v35 = vpack.c.bf16 %v1080_v34, %v1079_v33 }
 0x2e3   : > { %1526 = vmatprep.mubr.bf16.mxu0 %v1091_v35 }
 0x2e4   : > { %1527 = vmatmul.mubr.bf16.gmra.mrb[40].mxu0 %v1092_v9 }
 0x2e8   : > { %v1500_v10 = vpop.f32.mrb[28].mxu1 }
 0x2e9   : > { %v1033_v38 = vadd.f32 %v1500_v10, %v1981_v42  ;;  %v1024_v39 = vpop.f32.mrb[29].mxu1 }
 0x2ea   : > { %v1025_v60 = vadd.f32 %v1981_v42, %v1024_v39  ;;  %v1501_v36 = vpop.f32.mrb[30].mxu1 }
 0x2eb   : > { %v1069_v40 = vmul.f32 0.01, %v1033_v38  ;;  %v1036_v41 = vadd.f32 %v1501_v36, %v1981_v42  ;;  %v1027_v43 = vpop.f32.mrb[31].mxu1  ;;  %vm1053_vm13 = vcmp.gt.f32.partialorder %v1033_v38, 0.0 }
 0x2ec   : > { %v1067_v25 = vmul.f32 0.01, %v1025_v60  ;;  %v1028_v48 = vadd.f32 %v1981_v42, %v1027_v43  ;;  %vm1051_vm14 = vcmp.gt.f32.partialorder %v1025_v60, 0.0 }
 0x2ed   : > { %vm1054_vm15 = vcmp.gt.f32.partialorder %v1036_v41, 0.0  ;;  %v1070_v45 = vmul.f32 0.01, %v1036_v41  ;;  %v1085_v51 = vsel %vm1053_vm13, %v1033_v38, %v1069_v40 }
 0x2ee   : > { %vm1052_vm0 = vcmp.gt.f32.partialorder %v1028_v48, 0.0  ;;  %v1068_v49 = vmul.f32 0.01, %v1028_v48  ;;  %v1083_v56 = vsel %vm1051_vm14, %v1025_v60, %v1067_v25 }
 0x2ef   : > { %v1086_v52 = vsel %vm1054_vm15, %v1036_v41, %v1070_v45 }
 0x2f0   : > { %v1094_v54 = vpack.c.bf16 %v1086_v52, %v1085_v51  ;;  %v1084_v27 = vsel %vm1052_vm0, %v1028_v48, %v1068_v49 }
 0x2f1   : > { %v1093_v57 = vpack.c.bf16 %v1084_v27, %v1083_v56 }
 0x2f3   : > { %1530 = vmatprep.mubr.bf16.mxu1 %v1093_v57 }
 0x2f4   : > { %1531 = vmatmul.mubr.bf16.vlgmr.msra.gmra.mrb[32].mxu1 %v1094_v54 }
 0x397   : > { %v1520_v42 = vpop.f32.mrb[32].mxu0 }
 0x398   : > { %v1209_v58 = vadd.f32 %v1520_v42, %v1379_v55  ;;  %v1200_v28 = vpop.f32.mrb[33].mxu0 }
 0x399   : > { %v1201_v59 = vadd.f32 %v1379_v55, %v1200_v28  ;;  %v1521_v47 = vpop.f32.mrb[34].mxu0 }
 0x39a   : > { %1266 = vst.msk [vmem:[%s2007_s17 + $0x10] sm:$0xff] %vm1263_vm1, %v1209_v58  ;;  %v1212_v37 = vadd.f32 %v1521_v47, %v1379_v55  ;;  %v1203_v62 = vpop.f32.mrb[35].mxu0 }
 0x39b   : > { %1264 = vst.msk [vmem:[%s2007_s17] sm:$0xff] %vm1263_vm1, %v1201_v59  ;;  %v1204_v63 = vadd.f32 %v1379_v55, %v1203_v62 }
 0x39c   : > { %1267 = vst.msk [vmem:[%s2007_s17 + $0x18] sm:$0xff] %vm1263_vm1, %v1212_v37 }
 0x39d   : > { %1265 = vst.msk [vmem:[%s2007_s17 + $0x8] sm:$0xff] %vm1263_vm1, %v1204_v63 }
 0x3a7   : > { %v1524_v26 = vpop.f32.mrb[36].mxu0 }
 0x3a8   : > { %v1225_v0 = vadd.f32 %v1524_v26, %v1379_v55  ;;  %v1216_v61 = vpop.f32.mrb[37].mxu0 }
 0x3a9   : > { %v1217_v1 = vadd.f32 %v1379_v55, %v1216_v61  ;;  %v1525_v4 = vpop.f32.mrb[38].mxu0 }
 0x3aa   : > { %1270 = vst.msk [vmem:[%s2007_s17 + $0x30] sm:$0xff] %vm1263_vm1, %v1225_v0  ;;  %v1228_v44 = vadd.f32 %v1525_v4, %v1379_v55  ;;  %v1219_v50 = vpop.f32.mrb[39].mxu0 }
 0x3ab   : > { %1268 = vst.msk [vmem:[%s2007_s17 + $0x20] sm:$0xff] %vm1263_vm1, %v1217_v1  ;;  %v1220_v29 = vadd.f32 %v1379_v55, %v1219_v50 }
 0x3ac   : > { %1271 = vst.msk [vmem:[%s2007_s17 + $0x38] sm:$0xff] %vm1263_vm1, %v1228_v44 }
 0x3ad   : > { %1269 = vst.msk [vmem:[%s2007_s17 + $0x28] sm:$0xff] %vm1263_vm1, %v1220_v29 }
 0x3b7   : > { %v1528_v5 = vpop.f32.mrb[40].mxu0 }
 0x3b8   : > { %v1241_v6 = vadd.f32 %v1528_v5, %v1379_v55  ;;  %v1232_v32 = vpop.f32.mrb[41].mxu0 }
 0x3b9   : > { %v1233_v7 = vadd.f32 %v1379_v55, %v1232_v32  ;;  %v1529_v8 = vpop.f32.mrb[42].mxu0 }
 0x3ba   : > { %1274 = vst.msk [vmem:[%s2007_s17 + $0x50] sm:$0xff] %vm1263_vm1, %v1241_v6  ;;  %v1244_v11 = vadd.f32 %v1529_v8, %v1379_v55  ;;  %v1235_v12 = vpop.f32.mrb[43].mxu0 }
 0x3bb   : > { %1272 = vst.msk [vmem:[%s2007_s17 + $0x40] sm:$0xff] %vm1263_vm1, %v1233_v7  ;;  %v1236_v13 = vadd.f32 %v1379_v55, %v1235_v12 }
 0x3bc   : > { %1275 = vst.msk [vmem:[%s2007_s17 + $0x58] sm:$0xff] %vm1263_vm1, %v1244_v11 }
 0x3bd   : > { %1273 = vst.msk [vmem:[%s2007_s17 + $0x48] sm:$0xff] %vm1263_vm1, %v1236_v13 }
 0x3c7   : > { %v1532_v14 = vpop.f32.mrb[32].mxu1 }
 0x3c8   : > { %v1257_v16 = vadd.f32 %v1532_v14, %v1379_v55  ;;  %v1248_v17 = vpop.f32.mrb[33].mxu1 }
 0x3c9   : > { %v1249_v18 = vadd.f32 %v1379_v55, %v1248_v17  ;;  %v1533_v19 = vpop.f32.mrb[34].mxu1 }
 0x3ca   : > { %1278 = vst.msk [vmem:[%s2007_s17 + $0x70] sm:$0xff] %vm1263_vm1, %v1257_v16  ;;  %v1260_v20 = vadd.f32 %v1533_v19, %v1379_v55  ;;  %v1251_v46 = vpop.f32.mrb[35].mxu1 }
 0x3cb   : > { %1276 = vst.msk [vmem:[%s2007_s17 + $0x60] sm:$0xff] %vm1263_vm1, %v1249_v18  ;;  %v1252_v22 = vadd.f32 %v1379_v55, %v1251_v46 }
 0x3cc   : > { %1279 = vst.msk [vmem:[%s2007_s17 + $0x78] sm:$0xff] %vm1263_vm1, %v1260_v20 }
 0x3cd   : > { %1277 = vst.msk [vmem:[%s2007_s17 + $0x68] sm:$0xff] %vm1263_vm1, %v1252_v22 }
 0x3ce PF: > { %s19_s30 = sadd.s32 1, %s1633_s30  }
 0x3cf   : > { %p16_p4 = scmp.ge.s32.totalorder %s19_s30, 4  }
 0x3d1   :  { %18 = sbr.rel (!%p16_p4) target bundleno = 1 (0x1), region = 86 }

</bundles_post_ra>
